<compile_context>
chip_gen: v6e
topology: v6e:2x2x1
jax: 0.10.0
libtpu: 0.0.40
codegen_flags: <defaults>
</compile_context>

<pallas_src>
import functools
import math

import jax
import jax.numpy as jnp
from jax import lax
from jax.experimental import pallas as pl
from jax.experimental.pallas import tpu as pltpu

LANE = 128


def _round_up(n, m):
    return ((n + m - 1) // m) * m


def _layer_norm(x, gamma, beta, eps=1e-5):
    mean = jnp.mean(x, axis=-1, keepdims=True)
    var = jnp.mean(jnp.square(x - mean), axis=-1, keepdims=True)
    return (x - mean) * lax.rsqrt(var + eps) * gamma + beta


def encoder_block_kernel(x_ref, wq_ref, wkv_ref, wo_ref,
                         g1_ref, be1_ref, w1_ref, bb1_ref, w2_ref, bb2_ref,
                         g2_ref, be2_ref, o_ref, kv_ref, *, hp, tq):
    f32 = jnp.float32
    bf16 = jnp.bfloat16
    qi = pl.program_id(1)

    # ---- K|V projection: once per batch element, cached in VMEM scratch (bf16) ----
    @pl.when(qi == 0)
    def _():
        xkv_b = x_ref[...].astype(bf16)                                    # (S, D)
        kv = jnp.dot(xkv_b, wkv_ref[...], preferred_element_type=f32)     # (S, 2*Hp)
        kv_ref[...] = kv.astype(bf16)

    # query tile sliced from the resident full-sequence x block (x streamed once/batch)
    q_start = pl.multiple_of(qi * tq, tq)
    x_q = x_ref[pl.ds(q_start, tq), :]                                     # (TQ, D) f32
    # 1/sqrt(hidden_size) is already folded into wq by the wrapper.
    q = jnp.dot(x_q.astype(bf16), wq_ref[...], preferred_element_type=f32)  # (TQ, Hp)

    k = kv_ref[:, :hp]                                                     # (S, Hp) bf16
    v = kv_ref[:, hp:]                                                     # (S, Hp) bf16

    # scores: contract the last axes of q and k directly (no transpose materialized)
    scores = lax.dot_general(q.astype(bf16), k, (((1,), (1,)), ((), ())),
                             preferred_element_type=f32)                   # (TQ, S)
    scores = scores - jnp.max(scores, axis=-1, keepdims=True)
    p = jnp.exp(scores)
    row_sum = jnp.sum(p, axis=-1, keepdims=True)                           # (TQ, 1)
    # dropout on attention weights: identity (eval mode)
    ctx = jnp.dot(p.astype(bf16), v, preferred_element_type=f32)           # (TQ, Hp)
    # normalize AFTER the PV matmul: a (TQ, Hp) multiply instead of (TQ, S)
    ctx = ctx * pl.reciprocal(row_sum, approx=True)
    attn_out = jnp.dot(ctx.astype(bf16), wo_ref[...],
                       preferred_element_type=f32)                         # (TQ, D)

    # ---- residual + LayerNorm 1 (f32, two-pass statistics) ----
    res1 = _layer_norm(x_q + attn_out, g1_ref[...], be1_ref[...])

    # ---- FFN: Linear -> ReLU -> Linear (dropout identity) ----
    ff = jnp.dot(res1.astype(bf16), w1_ref[...],
                 preferred_element_type=f32) + bb1_ref[...]                # (TQ, Fp)
    ff = jnp.maximum(ff, 0.0)
    ff = jnp.dot(ff.astype(bf16), w2_ref[...],
                 preferred_element_type=f32) + bb2_ref[...]                # (TQ, D)

    # ---- residual + LayerNorm 2 ----
    o_ref[...] = _layer_norm(res1 + ff, g2_ref[...], be2_ref[...]).astype(o_ref.dtype)


def _choose_seq_tile(S, seq_tile):
    if S <= seq_tile:
        return S
    start = seq_tile - (seq_tile % 8)
    for cand in range(start, 7, -8):          # largest multiple-of-8 divisor <= seq_tile
        if S % cand == 0:
            return cand
    # TODO(synk): sequences with no multiple-of-8 divisor: pad S + mask the last tile.
    return S


def encoder_transformer_block(x, params, *, seq_tile=512):
    B, S, D = x.shape
    H = params["wq"].shape[1]
    F = params["w1"].shape[1]

    Hp = _round_up(H, LANE)
    Fp = _round_up(F, LANE)
    TQ = _choose_seq_tile(S, seq_tile)
    nq = S // TQ

    f32 = jnp.float32
    bf16 = jnp.bfloat16

    def pad_cols(a, cols):
        a = a.astype(f32)
        return jnp.pad(a, ((0, 0), (0, cols - a.shape[1])))

    def pad_rows(a, rows):
        a = a.astype(f32)
        return jnp.pad(a, ((0, rows - a.shape[0]), (0, 0)))

    # fold the attention scale 1/sqrt(H) into wq (one-time, wrapper side)
    wq = (pad_cols(params["wq"], Hp) * (1.0 / math.sqrt(H))).astype(bf16)      # (D, Hp)
    wkv = jnp.concatenate([pad_cols(params["wk"], Hp),
                           pad_cols(params["wv"], Hp)], axis=1).astype(bf16)   # (D, 2*Hp)
    wo = pad_rows(params["wo"], Hp).astype(bf16)                               # (Hp, D)
    w1 = pad_cols(params["w1"], Fp).astype(bf16)                               # (D, Fp)
    w2 = pad_rows(params["w2"], Fp).astype(bf16)                               # (Fp, D)
    bb1 = pad_cols(params["bb1"], Fp)                                          # (1, Fp) f32
    g1 = params["g1"].astype(f32)
    be1 = params["be1"].astype(f32)
    bb2 = params["bb2"].astype(f32)
    g2 = params["g2"].astype(f32)
    be2 = params["be2"].astype(f32)

    weights = [wq, wkv, wo, g1, be1, w1, bb1, w2, bb2, g2, be2]

    def full_spec(arr):
        n = arr.ndim
        return pl.BlockSpec(arr.shape, lambda b, qi, n=n: (0,) * n)

    # x block is the full sequence of one batch element; its index map is constant
    # over qi, so it is fetched once per batch element (queries are sliced in-kernel).
    x_spec = pl.BlockSpec((pl.Squeezed(), S, D), lambda b, qi: (b, 0, 0))
    out_spec = pl.BlockSpec((pl.Squeezed(), TQ, D), lambda b, qi: (b, qi, 0))

    kernel = functools.partial(encoder_block_kernel, hp=Hp, tq=TQ)

    # scoped-VMEM request sized from the actual block / scratch shapes (with margin)
    wbytes = sum(int(w.size) * w.dtype.itemsize for w in weights)
    est = (2 * S * D * 4            # resident x block (double-buffered)
           + 2 * TQ * D * 4         # output block (double-buffered)
           + S * 2 * Hp * 2         # cached K|V scratch (bf16)
           + 2 * wbytes             # weights (default double-buffered)
           + 2 * TQ * S * 4         # scores / exp intermediates
           + TQ * (Fp + 2 * Hp + 4 * D) * 4)
    vmem_limit = int(min(max(32 << 20, 2 * est), 100 << 20))

    out = pl.pallas_call(
        kernel,
        out_shape=jax.ShapeDtypeStruct((B, S, D), jnp.float32),
        grid_spec=pltpu.PrefetchScalarGridSpec(
            num_scalar_prefetch=0,
            grid=(B, nq),
            in_specs=[x_spec] + [full_spec(w) for w in weights],
            out_specs=out_spec,
            scratch_shapes=[pltpu.VMEM((S, 2 * Hp), bf16)],
        ),
        compiler_params=pltpu.CompilerParams(
            # qi must be sequential so the qi==0 K|V projection is valid for all tiles
            dimension_semantics=("parallel", "arbitrary"),
            vmem_limit_bytes=vmem_limit,
        ),
    )(x.astype(f32), *weights)
    return out


def _reference(x, p):
    def ln(v, g, b, eps=1e-5):
        m = jnp.mean(v, axis=-1, keepdims=True)
        va = jnp.mean((v - m) ** 2, axis=-1, keepdims=True)
        return (v - m) / jnp.sqrt(va + eps) * g + b

    q = x @ p["wq"]; k = x @ p["wk"]; v = x @ p["wv"]
    sc = jnp.einsum("bqh,bkh->bqk", q, k) / math.sqrt(q.shape[-1])
    attn = jax.nn.softmax(sc, axis=-1)
    attn_out = jnp.einsum("bqk,bkh->bqh", attn, v) @ p["wo"]
    r1 = ln(x + attn_out, p["g1"], p["be1"])
    ff = jnp.maximum(r1 @ p["w1"] + p["bb1"], 0.0) @ p["w2"] + p["bb2"]
    return ln(r1 + ff, p["g2"], p["be2"])


if __name__ == "__main__":
    B, S, D, H, F = 2, 8, 32, 32, 64   # batch, seq, input_size, hidden_size, dim_feedforward

    key = jax.random.PRNGKey(0)
    ks = jax.random.split(key, 8)
    x = jax.random.normal(ks[0], (B, S, D), dtype=jnp.float32)

    scale = 0.1
    params = {
        "wq":  scale * jax.random.normal(ks[1], (D, H), dtype=jnp.float32),
        "wk":  scale * jax.random.normal(ks[2], (D, H), dtype=jnp.float32),
        "wv":  scale * jax.random.normal(ks[3], (D, H), dtype=jnp.float32),
        "wo":  scale * jax.random.normal(ks[4], (H, D), dtype=jnp.float32),
        "g1":  jnp.ones((1, D), dtype=jnp.float32),
        "be1": jnp.zeros((1, D), dtype=jnp.float32),
        "w1":  scale * jax.random.normal(ks[5], (D, F), dtype=jnp.float32),
        "bb1": jnp.zeros((1, F), dtype=jnp.float32),
        "w2":  scale * jax.random.normal(ks[6], (F, D), dtype=jnp.float32),
        "bb2": jnp.zeros((1, D), dtype=jnp.float32),
        "g2":  jnp.ones((1, D), dtype=jnp.float32),
        "be2": jnp.zeros((1, D), dtype=jnp.float32),
    }

    out = encoder_transformer_block(x, params)
    out = jax.block_until_ready(out)

    ref = _reference(x, params)
    assert out.shape == (B, S, D)
    # tolerance reflects bf16 MXU operands (f32 accumulation, f32 softmax/LayerNorm stats)
    assert jnp.allclose(out, ref, atol=3e-2, rtol=3e-2), "mismatch vs pure-JAX reference"

    print("KERNEL_OK")
</pallas_src>

<mosaic_0001>
module attributes {stable_mosaic.version = 11 : i64} {
  func.func @encoder_block_kernel(%arg0: i32, %arg1: i32, %arg2: memref<1x8x32xf32, #tpu.memory_space<vmem>>, %arg3: memref<32x128xbf16, #tpu.memory_space<vmem>>, %arg4: memref<32x256xbf16, #tpu.memory_space<vmem>>, %arg5: memref<128x32xbf16, #tpu.memory_space<vmem>>, %arg6: memref<1x32xf32, #tpu.memory_space<vmem>>, %arg7: memref<1x32xf32, #tpu.memory_space<vmem>>, %arg8: memref<32x128xbf16, #tpu.memory_space<vmem>>, %arg9: memref<1x128xf32, #tpu.memory_space<vmem>>, %arg10: memref<128x32xbf16, #tpu.memory_space<vmem>>, %arg11: memref<1x32xf32, #tpu.memory_space<vmem>>, %arg12: memref<1x32xf32, #tpu.memory_space<vmem>>, %arg13: memref<1x32xf32, #tpu.memory_space<vmem>>, %arg14: memref<1x8x32xf32, #tpu.memory_space<vmem>>, %arg15: memref<8x256xbf16, #tpu.memory_space<vmem>>) attributes {dimension_semantics = [#tpu.dimension_semantics<parallel>, #tpu.dimension_semantics<arbitrary>], iteration_bounds = array<i64: 2, 1>, scalar_prefetch = 0 : i64, scratch_operands = 1 : i64, tpu.core_type = #tpu.core_type<tc>, window_params = [{transform_indices = @transform_0, window_bounds = array<i64: 1, 8, 32>}, {pipeline_mode = #tpu.pipeline_mode<synchronous>, transform_indices = @transform_1, window_bounds = array<i64: 32, 128>}, {pipeline_mode = #tpu.pipeline_mode<synchronous>, transform_indices = @transform_2, window_bounds = array<i64: 32, 256>}, {pipeline_mode = #tpu.pipeline_mode<synchronous>, transform_indices = @transform_3, window_bounds = array<i64: 128, 32>}, {pipeline_mode = #tpu.pipeline_mode<synchronous>, transform_indices = @transform_4, window_bounds = array<i64: 1, 32>}, {pipeline_mode = #tpu.pipeline_mode<synchronous>, transform_indices = @transform_5, window_bounds = array<i64: 1, 32>}, {pipeline_mode = #tpu.pipeline_mode<synchronous>, transform_indices = @transform_6, window_bounds = array<i64: 32, 128>}, {pipeline_mode = #tpu.pipeline_mode<synchronous>, transform_indices = @transform_7, window_bounds = array<i64: 1, 128>}, {pipeline_mode = #tpu.pipeline_mode<synchronous>, transform_indices = @transform_8, window_bounds = array<i64: 128, 32>}, {pipeline_mode = #tpu.pipeline_mode<synchronous>, transform_indices = @transform_9, window_bounds = array<i64: 1, 32>}, {pipeline_mode = #tpu.pipeline_mode<synchronous>, transform_indices = @transform_10, window_bounds = array<i64: 1, 32>}, {pipeline_mode = #tpu.pipeline_mode<synchronous>, transform_indices = @transform_11, window_bounds = array<i64: 1, 32>}, {transform_indices = @transform_12, window_bounds = array<i64: 1, 8, 32>}]} {
    %c0_i32 = arith.constant 0 : i32
    %0 = arith.cmpi eq, %arg1, %c0_i32 : i32
    %1 = arith.extui %0 : i1 to i32
    %c0_i32_0 = arith.constant 0 : i32
    %2 = arith.cmpi ne, %1, %c0_i32_0 : i32
    scf.if %2 {
      %c0_46 = arith.constant 0 : index
      %c0_47 = arith.constant 0 : index
      %c0_48 = arith.constant 0 : index
      %97 = vector.load %arg2[%c0_46, %c0_47, %c0_48] : memref<1x8x32xf32, #tpu.memory_space<vmem>>, vector<1x8x32xf32>
      %98 = vector.shape_cast %97 : vector<1x8x32xf32> to vector<8x32xf32>
      %99 = arith.truncf %98 : vector<8x32xf32> to vector<8x32xbf16>
      %c0_49 = arith.constant 0 : index
      %c0_50 = arith.constant 0 : index
      %100 = vector.load %arg4[%c0_49, %c0_50] : memref<32x256xbf16, #tpu.memory_space<vmem>>, vector<32x256xbf16>
      %cst_51 = arith.constant dense<0.000000e+00> : vector<8x256xf32>
      %101 = tpu.matmul %99, %100, %cst_51 {dimension_numbers = #tpu.dot_dimension_numbers<[1], [0], [0], [1], [0, 0, 1, 1], [], []>} : vector<8x32xbf16>, vector<32x256xbf16>, vector<8x256xf32> -> vector<8x256xf32>
      %102 = arith.truncf %101 : vector<8x256xf32> to vector<8x256xbf16>
      %c0_52 = arith.constant 0 : index
      %c0_53 = arith.constant 0 : index
      %103 = vector.load %arg15[%c0_52, %c0_53] : memref<8x256xbf16, #tpu.memory_space<vmem>>, vector<8x256xbf16>
      tpu.vector_store %arg15[%c0_52, %c0_53], %102 {strides = array<i32>} : memref<8x256xbf16, #tpu.memory_space<vmem>>, vector<8x256xbf16>,
    } else {
    }
    %c8_i32 = arith.constant 8 : i32
    %3 = arith.muli %arg1, %c8_i32 : i32
    %4 = tpu.assume_multiple %3, 8 : i32
    %c0 = arith.constant 0 : index
    %5 = arith.index_cast %4 : i32 to index
    %c0_1 = arith.constant 0 : index
    %6 = vector.load %arg2[%c0, %5, %c0_1] : memref<1x8x32xf32, #tpu.memory_space<vmem>>, vector<1x8x32xf32>
    %7 = vector.shape_cast %6 : vector<1x8x32xf32> to vector<8x32xf32>
    %8 = arith.truncf %7 : vector<8x32xf32> to vector<8x32xbf16>
    %c0_2 = arith.constant 0 : index
    %c0_3 = arith.constant 0 : index
    %9 = vector.load %arg3[%c0_2, %c0_3] : memref<32x128xbf16, #tpu.memory_space<vmem>>, vector<32x128xbf16>
    %cst = arith.constant dense<0.000000e+00> : vector<8x128xf32>
    %10 = tpu.matmul %8, %9, %cst {dimension_numbers = #tpu.dot_dimension_numbers<[1], [0], [0], [1], [0, 0, 1, 1], [], []>} : vector<8x32xbf16>, vector<32x128xbf16>, vector<8x128xf32> -> vector<8x128xf32>
    %c0_4 = arith.constant 0 : index
    %c0_5 = arith.constant 0 : index
    %11 = vector.load %arg15[%c0_4, %c0_5] : memref<8x256xbf16, #tpu.memory_space<vmem>>, vector<8x128xbf16>
    %c0_6 = arith.constant 0 : index
    %c128 = arith.constant 128 : index
    %12 = vector.load %arg15[%c0_6, %c128] : memref<8x256xbf16, #tpu.memory_space<vmem>>, vector<8x128xbf16>
    %13 = arith.truncf %10 : vector<8x128xf32> to vector<8x128xbf16>
    %cst_7 = arith.constant dense<0.000000e+00> : vector<8x8xf32>
    %14 = tpu.matmul %13, %11, %cst_7 {dimension_numbers = #tpu.dot_dimension_numbers<[1], [1], [0], [0], [0, 0, 1, 0], [], []>} : vector<8x128xbf16>, vector<8x128xbf16>, vector<8x8xf32> -> vector<8x8xf32>
    %cst_8 = arith.constant dense<0xFF800000> : vector<8xf32>
    %15 = vector.multi_reduction <maximumf>, %14, %cst_8 [1] : vector<8x8xf32> to vector<8xf32>
    %16 = vector.shape_cast %15 : vector<8xf32> to vector<8x1xf32>
    %17 = vector.broadcast %16 : vector<8x1xf32> to vector<8x8xf32>
    %18 = arith.subf %14, %17 : vector<8x8xf32>
    %19 = math.exp %18 : vector<8x8xf32>
    %cst_9 = arith.constant dense<0.000000e+00> : vector<8xf32>
    %20 = vector.multi_reduction <add>, %19, %cst_9 [1] : vector<8x8xf32> to vector<8xf32>
    %21 = vector.shape_cast %20 : vector<8xf32> to vector<8x1xf32>
    %22 = arith.truncf %19 : vector<8x8xf32> to vector<8x8xbf16>
    %cst_10 = arith.constant dense<0.000000e+00> : vector<8x128xf32>
    %23 = tpu.matmul %22, %12, %cst_10 {dimension_numbers = #tpu.dot_dimension_numbers<[1], [0], [0], [1], [0, 0, 1, 1], [], []>} : vector<8x8xbf16>, vector<8x128xbf16>, vector<8x128xf32> -> vector<8x128xf32>
    %24 = tpu.reciprocal %21 {approx = true} : vector<8x1xf32> -> vector<8x1xf32>
    %25 = vector.broadcast %24 : vector<8x1xf32> to vector<8x128xf32>
    %26 = arith.mulf %23, %25 : vector<8x128xf32>
    %27 = arith.truncf %26 : vector<8x128xf32> to vector<8x128xbf16>
    %c0_11 = arith.constant 0 : index
    %c0_12 = arith.constant 0 : index
    %28 = vector.load %arg5[%c0_11, %c0_12] : memref<128x32xbf16, #tpu.memory_space<vmem>>, vector<128x32xbf16>
    %cst_13 = arith.constant dense<0.000000e+00> : vector<8x32xf32>
    %29 = tpu.matmul %27, %28, %cst_13 {dimension_numbers = #tpu.dot_dimension_numbers<[1], [0], [0], [1], [0, 0, 1, 1], [], []>} : vector<8x128xbf16>, vector<128x32xbf16>, vector<8x32xf32> -> vector<8x32xf32>
    %30 = arith.addf %7, %29 : vector<8x32xf32>
    %c0_14 = arith.constant 0 : index
    %c0_15 = arith.constant 0 : index
    %31 = vector.load %arg6[%c0_14, %c0_15] : memref<1x32xf32, #tpu.memory_space<vmem>>, vector<1x32xf32>
    %c0_16 = arith.constant 0 : index
    %c0_17 = arith.constant 0 : index
    %32 = vector.load %arg7[%c0_16, %c0_17] : memref<1x32xf32, #tpu.memory_space<vmem>>, vector<1x32xf32>
    %cst_18 = arith.constant dense<0.000000e+00> : vector<8xf32>
    %33 = vector.multi_reduction <add>, %30, %cst_18 [1] : vector<8x32xf32> to vector<8xf32>
    %34 = vector.shape_cast %33 : vector<8xf32> to vector<8x1xf32>
    %cst_19 = arith.constant 3.200000e+01 : f32
    %35 = vector.broadcast %cst_19 : f32 to vector<8x1xf32>
    %36 = arith.divf %34, %35 : vector<8x1xf32>
    %37 = vector.broadcast %36 : vector<8x1xf32> to vector<8x32xf32>
    %38 = arith.subf %30, %37 : vector<8x32xf32>
    %39 = arith.mulf %38, %38 : vector<8x32xf32>
    %cst_20 = arith.constant dense<0.000000e+00> : vector<8xf32>
    %40 = vector.multi_reduction <add>, %39, %cst_20 [1] : vector<8x32xf32> to vector<8xf32>
    %41 = vector.shape_cast %40 : vector<8xf32> to vector<8x1xf32>
    %cst_21 = arith.constant 3.200000e+01 : f32
    %42 = vector.broadcast %cst_21 : f32 to vector<8x1xf32>
    %43 = arith.divf %41, %42 : vector<8x1xf32>
    %44 = vector.broadcast %36 : vector<8x1xf32> to vector<8x32xf32>
    %45 = arith.subf %30, %44 : vector<8x32xf32>
    %cst_22 = arith.constant 9.99999974E-6 : f32
    %46 = vector.broadcast %cst_22 : f32 to vector<8x1xf32>
    %47 = arith.addf %43, %46 : vector<8x1xf32>
    %48 = math.rsqrt %47 : vector<8x1xf32>
    %49 = vector.broadcast %48 : vector<8x1xf32> to vector<8x32xf32>
    %50 = arith.mulf %45, %49 : vector<8x32xf32>
    %51 = vector.broadcast %31 : vector<1x32xf32> to vector<8x32xf32>
    %52 = arith.mulf %50, %51 : vector<8x32xf32>
    %53 = vector.broadcast %32 : vector<1x32xf32> to vector<8x32xf32>
    %54 = arith.addf %52, %53 : vector<8x32xf32>
    %55 = arith.truncf %54 : vector<8x32xf32> to vector<8x32xbf16>
    %c0_23 = arith.constant 0 : index
    %c0_24 = arith.constant 0 : index
    %56 = vector.load %arg8[%c0_23, %c0_24] : memref<32x128xbf16, #tpu.memory_space<vmem>>, vector<32x128xbf16>
    %cst_25 = arith.constant dense<0.000000e+00> : vector<8x128xf32>
    %57 = tpu.matmul %55, %56, %cst_25 {dimension_numbers = #tpu.dot_dimension_numbers<[1], [0], [0], [1], [0, 0, 1, 1], [], []>} : vector<8x32xbf16>, vector<32x128xbf16>, vector<8x128xf32> -> vector<8x128xf32>
    %c0_26 = arith.constant 0 : index
    %c0_27 = arith.constant 0 : index
    %58 = vector.load %arg9[%c0_26, %c0_27] : memref<1x128xf32, #tpu.memory_space<vmem>>, vector<1x128xf32>
    %59 = vector.broadcast %58 : vector<1x128xf32> to vector<8x128xf32>
    %60 = arith.addf %57, %59 : vector<8x128xf32>
    %cst_28 = arith.constant 0.000000e+00 : f32
    %61 = vector.broadcast %cst_28 : f32 to vector<8x128xf32>
    %62 = arith.maximumf %60, %61 : vector<8x128xf32>
    %63 = arith.truncf %62 : vector<8x128xf32> to vector<8x128xbf16>
    %c0_29 = arith.constant 0 : index
    %c0_30 = arith.constant 0 : index
    %64 = vector.load %arg10[%c0_29, %c0_30] : memref<128x32xbf16, #tpu.memory_space<vmem>>, vector<128x32xbf16>
    %cst_31 = arith.constant dense<0.000000e+00> : vector<8x32xf32>
    %65 = tpu.matmul %63, %64, %cst_31 {dimension_numbers = #tpu.dot_dimension_numbers<[1], [0], [0], [1], [0, 0, 1, 1], [], []>} : vector<8x128xbf16>, vector<128x32xbf16>, vector<8x32xf32> -> vector<8x32xf32>
    %c0_32 = arith.constant 0 : index
    %c0_33 = arith.constant 0 : index
    %66 = vector.load %arg11[%c0_32, %c0_33] : memref<1x32xf32, #tpu.memory_space<vmem>>, vector<1x32xf32>
    %67 = vector.broadcast %66 : vector<1x32xf32> to vector<8x32xf32>
    %68 = arith.addf %65, %67 : vector<8x32xf32>
    %69 = arith.addf %54, %68 : vector<8x32xf32>
    %c0_34 = arith.constant 0 : index
    %c0_35 = arith.constant 0 : index
    %70 = vector.load %arg12[%c0_34, %c0_35] : memref<1x32xf32, #tpu.memory_space<vmem>>, vector<1x32xf32>
    %c0_36 = arith.constant 0 : index
    %c0_37 = arith.constant 0 : index
    %71 = vector.load %arg13[%c0_36, %c0_37] : memref<1x32xf32, #tpu.memory_space<vmem>>, vector<1x32xf32>
    %cst_38 = arith.constant dense<0.000000e+00> : vector<8xf32>
    %72 = vector.multi_reduction <add>, %69, %cst_38 [1] : vector<8x32xf32> to vector<8xf32>
    %73 = vector.shape_cast %72 : vector<8xf32> to vector<8x1xf32>
    %cst_39 = arith.constant 3.200000e+01 : f32
    %74 = vector.broadcast %cst_39 : f32 to vector<8x1xf32>
    %75 = arith.divf %73, %74 : vector<8x1xf32>
    %76 = vector.broadcast %75 : vector<8x1xf32> to vector<8x32xf32>
    %77 = arith.subf %69, %76 : vector<8x32xf32>
    %78 = arith.mulf %77, %77 : vector<8x32xf32>
    %cst_40 = arith.constant dense<0.000000e+00> : vector<8xf32>
    %79 = vector.multi_reduction <add>, %78, %cst_40 [1] : vector<8x32xf32> to vector<8xf32>
    %80 = vector.shape_cast %79 : vector<8xf32> to vector<8x1xf32>
    %cst_41 = arith.constant 3.200000e+01 : f32
    %81 = vector.broadcast %cst_41 : f32 to vector<8x1xf32>
    %82 = arith.divf %80, %81 : vector<8x1xf32>
    %83 = vector.broadcast %75 : vector<8x1xf32> to vector<8x32xf32>
    %84 = arith.subf %69, %83 : vector<8x32xf32>
    %cst_42 = arith.constant 9.99999974E-6 : f32
    %85 = vector.broadcast %cst_42 : f32 to vector<8x1xf32>
    %86 = arith.addf %82, %85 : vector<8x1xf32>
    %87 = math.rsqrt %86 : vector<8x1xf32>
    %88 = vector.broadcast %87 : vector<8x1xf32> to vector<8x32xf32>
    %89 = arith.mulf %84, %88 : vector<8x32xf32>
    %90 = vector.broadcast %70 : vector<1x32xf32> to vector<8x32xf32>
    %91 = arith.mulf %89, %90 : vector<8x32xf32>
    %92 = vector.broadcast %71 : vector<1x32xf32> to vector<8x32xf32>
    %93 = arith.addf %91, %92 : vector<8x32xf32>
    %c0_43 = arith.constant 0 : index
    %c0_44 = arith.constant 0 : index
    %c0_45 = arith.constant 0 : index
    %94 = vector.load %arg14[%c0_43, %c0_44, %c0_45] : memref<1x8x32xf32, #tpu.memory_space<vmem>>, vector<1x8x32xf32>
    %95 = vector.shape_cast %94 : vector<1x8x32xf32> to vector<8x32xf32>
    %96 = vector.shape_cast %93 : vector<8x32xf32> to vector<1x8x32xf32>
    tpu.vector_store %arg14[%c0_43, %c0_44, %c0_45], %96 {strides = array<i32>} : memref<1x8x32xf32, #tpu.memory_space<vmem>>, vector<1x8x32xf32>,
    return
  }
  func.func @transform_0(%arg0: i32, %arg1: i32) -> (i32, i32, i32) {
    %c0_i32 = arith.constant 0 : i32
    %c0_i32_0 = arith.constant 0 : i32
    %c0_i32_1 = arith.constant 0 : i32
    return %arg0, %c0_i32, %c0_i32_0 : i32, i32, i32
  }
  func.func @transform_1(%arg0: i32, %arg1: i32) -> (i32, i32) {
    %c0_i32 = arith.constant 0 : i32
    %c0_i32_0 = arith.constant 0 : i32
    %c0_i32_1 = arith.constant 0 : i32
    return %c0_i32, %c0_i32_0 : i32, i32
  }
  func.func @transform_2(%arg0: i32, %arg1: i32) -> (i32, i32) {
    %c0_i32 = arith.constant 0 : i32
    %c0_i32_0 = arith.constant 0 : i32
    %c0_i32_1 = arith.constant 0 : i32
    return %c0_i32, %c0_i32_0 : i32, i32
  }
  func.func @transform_3(%arg0: i32, %arg1: i32) -> (i32, i32) {
    %c0_i32 = arith.constant 0 : i32
    %c0_i32_0 = arith.constant 0 : i32
    %c0_i32_1 = arith.constant 0 : i32
    return %c0_i32, %c0_i32_0 : i32, i32
  }
  func.func @transform_4(%arg0: i32, %arg1: i32) -> (i32, i32) {
    %c0_i32 = arith.constant 0 : i32
    %c0_i32_0 = arith.constant 0 : i32
    %c0_i32_1 = arith.constant 0 : i32
    return %c0_i32, %c0_i32_0 : i32, i32
  }
  func.func @transform_5(%arg0: i32, %arg1: i32) -> (i32, i32) {
    %c0_i32 = arith.constant 0 : i32
    %c0_i32_0 = arith.constant 0 : i32
    %c0_i32_1 = arith.constant 0 : i32
    return %c0_i32, %c0_i32_0 : i32, i32
  }
  func.func @transform_6(%arg0: i32, %arg1: i32) -> (i32, i32) {
    %c0_i32 = arith.constant 0 : i32
    %c0_i32_0 = arith.constant 0 : i32
    %c0_i32_1 = arith.constant 0 : i32
    return %c0_i32, %c0_i32_0 : i32, i32
  }
  func.func @transform_7(%arg0: i32, %arg1: i32) -> (i32, i32) {
    %c0_i32 = arith.constant 0 : i32
    %c0_i32_0 = arith.constant 0 : i32
    %c0_i32_1 = arith.constant 0 : i32
    return %c0_i32, %c0_i32_0 : i32, i32
  }
  func.func @transform_8(%arg0: i32, %arg1: i32) -> (i32, i32) {
    %c0_i32 = arith.constant 0 : i32
    %c0_i32_0 = arith.constant 0 : i32
    %c0_i32_1 = arith.constant 0 : i32
    return %c0_i32, %c0_i32_0 : i32, i32
  }
  func.func @transform_9(%arg0: i32, %arg1: i32) -> (i32, i32) {
    %c0_i32 = arith.constant 0 : i32
    %c0_i32_0 = arith.constant 0 : i32
    %c0_i32_1 = arith.constant 0 : i32
    return %c0_i32, %c0_i32_0 : i32, i32
  }
  func.func @transform_10(%arg0: i32, %arg1: i32) -> (i32, i32) {
    %c0_i32 = arith.constant 0 : i32
    %c0_i32_0 = arith.constant 0 : i32
    %c0_i32_1 = arith.constant 0 : i32
    return %c0_i32, %c0_i32_0 : i32, i32
  }
  func.func @transform_11(%arg0: i32, %arg1: i32) -> (i32, i32) {
    %c0_i32 = arith.constant 0 : i32
    %c0_i32_0 = arith.constant 0 : i32
    %c0_i32_1 = arith.constant 0 : i32
    return %c0_i32, %c0_i32_0 : i32, i32
  }
  func.func @transform_12(%arg0: i32, %arg1: i32) -> (i32, i32, i32) {
    %c0_i32 = arith.constant 0 : i32
    %c0_i32_0 = arith.constant 0 : i32
    return %arg0, %arg1, %c0_i32 : i32, i32, i32
  }
}

</mosaic_0001>

<bundles_post_ra>
// kernel: tpu_custom_call.1
= control target key start
LH: loop header
LB: loop body
LE: loop exit
PB: predicated region body
PF: predicated region fallthrough
CT: control target
= control target key end

     0   :  { %s1725_s0 = inlined_call_operand.vmem [shape: f32[2,8,32], index: 0, kind: input, shape index: {}]   ;;  %s1726_s1 = inlined_call_operand.vmem [shape: bf16[32,128], index: 1, kind: input, shape index: {}]   ;;  %s1727_s2 = inlined_call_operand.vmem [shape: bf16[32,256], index: 2, kind: input, shape index: {}]   ;;  %s1728_s3 = inlined_call_operand.vmem [shape: bf16[128,32], index: 3, kind: input, shape index: {}]   ;;  %s1729_s4 = inlined_call_operand.vmem [shape: f32[1,32], index: 4, kind: input, shape index: {}]   ;;  %s1730_s5 = inlined_call_operand.vmem [shape: f32[1,32], index: 5, kind: input, shape index: {}]   ;;  %s1731_s6 = inlined_call_operand.vmem [shape: bf16[32,128], index: 6, kind: input, shape index: {}]   ;;  %s1732_s7 = inlined_call_operand.vmem [shape: f32[1,128], index: 7, kind: input, shape index: {}]   ;;  %s1733_s8 = inlined_call_operand.vmem [shape: bf16[128,32], index: 8, kind: input, shape index: {}]   ;;  %s1734_s9 = inlined_call_operand.vmem [shape: f32[1,32], index: 9, kind: input, shape index: {}]   ;;  %s1735_s10 = inlined_call_operand.vmem [shape: f32[1,32], index: 10, kind: input, shape index: {}]   ;;  %s1736_s11 = inlined_call_operand.vmem [shape: f32[1,32], index: 11, kind: input, shape index: {}]   ;;  %s1737_s12 = inlined_call_operand.hbm [shape: f32[2,8,32], index: 12, kind: output, shape index: {}]  }
   0x1   :  { %1740 = sst [smem:[#allocation8_spill]] %s1725_s0 }
   0x2   :  { %1741 = sst [smem:[#allocation9_spill]] %s1726_s1 }
   0x3   :  { %1742 = sst [smem:[#allocation10_spill]] %s1727_s2 }
   0x4   :  { %17 = vsyncpa [#allocation4], 0 }
   0x5   :  { %19 = vsyncpa [#allocation4 + $0x1], 0  ;;  %s1489_s21 = smov 0   ;;  %s1491_s22 = smov 0  }
   0x6   :  { %s1493_s23 = smov 0   ;;  %s1495_s24 = smov 0  }
   0x7   :  { %s1497_s25 = smov 0   ;;  %s1499_s26 = smov 0  }
   0x8 LB: > { %1743 = sst [smem:[#allocation6_spill]] %s1414_s25  ;;  %s1107_s27 = sadd.s32 4294967295, %s1418_s26   ;;  %s1418_s26 = sphi %s1499_s26, %s25_s26   ;;  %s1414_s25 = sphi %s1497_s25, %s1751_s25   ;;  %s1410_s24 = sphi %s1495_s24, %s1750_s24   ;;  %s1406_s23 = sphi %s1493_s23, %s1754_s23   ;;  %s1402_s22 = sphi %s1491_s22, %s1753_s22   ;;  %s1398_s21 = sphi %s1489_s21, %s1752_s21  }
   0x9   : > { %s1108_s28 = sadd.s32 4294967294, %s1418_s26   ;;  %s37_s29 = sadd.s32 1, %s1414_s25 }
   0xa   : > { %s303_s30 = sadd.s32 1, %s1406_s23  ;;  %p39_p0 = scmp.ge.s32.totalorder %s37_s29, 2 }
   0xb   : > { %p313_p1 = scmp.ne.s32.totalorder %s1406_s23, %s1402_s22  ;;  %p314_p2 = scmp.eq.s32.totalorder %s1107_s27, 1 }
   0xc   : > { %p319_p3 = scmp.ne.s32.totalorder %s1402_s22, %s1398_s21  ;;  %s1756_s29 = smov (%p39_p0, %s37_s29), 0 }
   0xd   : > { %1744 = sst [smem:[#allocation7_spill]] %s1756_s29  ;;  %p1529_p4 = por %p314_p2, %p313_p1 }
   0xe   : > { %p320_p5 = scmp.eq.s32.totalorder %s1108_s28, 1  ;;  %s298_s14 = ssub.s32 %s1414_s25, %s1756_s29 }
   0xf   : > { %p1111_p6 = scmp.ge.s32.totalorder %s1418_s26, 1  ;;  %p301_p7 = scmp.eq.s32.totalorder %s298_s14, 0 }
  0x10   : > { %p1536_p8 = por %p320_p5, %p319_p3  ;;  %p378_p9 = scmp.lt.s32.totalorder %s1418_s26, 3 }
  0x11   : > { %s1542_s16 = scalar_select %p301_p7, %s1406_s23, %s303_s30  }
  0x12   : > { %p379_p10 = pnand %p1111_p6, %p378_p9 }
  0x13   : > { %s1747_s2 = sld [smem:[#allocation10_spill]] (!%p379_p10)  ;;  %p419_p11 = scmp.lt.s32.totalorder (!%p379_p10), %s1410_s24, 1 }
  0x14   : > { %382 = sbr.rel (%p379_p10) target bundleno = 2017 (0x7e1), region = 68  ;;  %s1748_s1 = sld [smem:[#allocation9_spill]] (!%p379_p10) }
  0x15   : > { %s1749_s0 = sld [smem:[#allocation8_spill]] (!%p379_p10)  ;;  %s416_s18 = sand.u32 (!%p379_p10), 1, %s1402_s22  }
  0x16   : > { %s1150_s25 = sshll.u32 (!%p379_p10), %s1410_s24, 7  ;;  %s1423_s27 = smov (!%p379_p10), [#allocation3]  }
  0x17   : > { %s1346_s28 = sshll.u32 (!%p379_p10), %s1423_s27, 4  ;;  %s1347_s28 = int_to_ptr.vmem [resolvable:$false] %s1346_s28 }
  0x19   : > { %v1308_v0 = vld [vmem:[%s1747_s2 + $0x14] ss:$8 sps:$4 sm:$0xff]   ;;  %v1310_v1 = vld [vmem:[%s1747_s2 + $0x10] ss:$8 sps:$4 sm:$0xff]   ;;  %v1420_v2 = vmov 0   ;;  %s420_s17 = scalar_select %p419_p11, %s1410_s24, 1 }
  0x1a   : > { %490 = vmatprep.mubr.bf16.mxu0 %v1420_v2  ;;  %470 = vmatprep.subr.bf16.mxu0 %v1308_v0  ;;  %v1311_v3 = vld [vmem:[%s1747_s2 + $0x4] ss:$8 sps:$4 sm:$0xff]   ;;  %v1313_v4 = vld [vmem:[%s1747_s2] ss:$8 sps:$4 sm:$0xff]   ;;  %v1421_v5 = vmov 0.0   ;;  %vm1422_vm0 = vmmov 0  }
  0x1b   : > { %1182 = vmatprep.subr.bf16.mxu1 %v1421_v5  ;;  %v1314_v6 = vld [vmem:[%s1748_s1 + $0x8] sm:$0xff]   ;;  %471 = vmatpush1.bf16.msra.mxu0 %v1310_v1  ;;  %s1113_s19 = sshll.u32 %s420_s17, 3  ;;  %v1315_v7 = vld [vmem:[%s1748_s1] sm:$0xff]   ;;  %vm454_vm1 = vcmask 261120   ;;  %vm629_vm2 = vcmask 1043456   ;;  %vm615_vm3 = vcmask 64512   ;;  %s1035_s1 = scalar_lea.hbm %s1737_s12, %s1150_s25 }
  0x1c   : > { %472 = vmatprep.subr.bf16.mxu0 %v1311_v3  ;;  %1183 = vmatpush3.bf16.msra.mxu1 %v1314_v6  ;;  %s422_s30 = scalar_lea.vmem %s1749_s0, %s1113_s19  ;;  %v1316_v34 = vld [vmem:[%s1728_s3 + $0x38] sm:$0xff]   ;;  %v1317_v35 = vld [vmem:[%s1728_s3 + $0x30] sm:$0xff]   ;;  %v1318_v36 = vld [vmem:[%s1728_s3 + $0x28] sm:$0xff]   ;;  %s1112_s19 = sshll.u32 %s416_s18, 3 }
  0x1d   : > { %1184 = vmatprep.subr.bf16.mxu1 %v1421_v5  ;;  %1186 = vmatprep.mubr.msk.bf16.mxu1 %vm1422_vm0, %v1421_v5  ;;  %v1571_v8 = vld [vmem:[%s422_s30] sm:$0xff]  ;;  %v1320_v38 = vld [vmem:[%s1728_s3 + $0x18] sm:$0xff]   ;;  %v1321_v39 = vld [vmem:[%s1728_s3 + $0x10] sm:$0xff]   ;;  %s418_s29 = scalar_lea.vmem [#allocation3], %s1112_s19  ;;  %s1023_s2 = scalar_lea.sflag [#allocation4], %s416_s18 }
  0x1e   : > { %v429_v9 = vpack.c.bf16 %v1571_v8, %v1571_v8  ;;  %v1319_v37 = vld [vmem:[%s1728_s3 + $0x20] sm:$0xff]   ;;  %v1322_v40 = vld [vmem:[%s1728_s3 + $0x8] sm:$0xff]   ;;  %s1037_s14 = sshll.u32 %s418_s29, 4  ;;  %s1348_s24 = scalar_lea.vmem %s1347_s28, 256  ;;  %s1038_s14 = int_to_ptr.vmem [resolvable:$true] %s1037_s14 }
  0x1f   : > { %473 = vmatpush1.bf16.msra.mxu0 %v1313_v4  ;;  %v1323_v41 = vld [vmem:[%s1728_s3] sm:$0xff]   ;;  %v1324_v61 = vld [vmem:[%s1731_s6 + $0x8] sm:$0xff]   ;;  %s1342_s20 = scalar_lea.vmem %s1038_s14, 128  ;;  %p1349_p1 = scmp.lt.s32.totalorder %s1038_s14, %s1347_s28 }
  0x20   : > { %1185 = vmatpush3.bf16.msra.mxu1 %v1315_v7  ;;  %1190 = vmatprep.subr.bf16.mxu0 %v1421_v5  ;;  %v1325_v62 = vld [vmem:[%s1731_s6] sm:$0xff]   ;;  %p1343_p12 = scmp.ne.s32.totalorder %s1038_s14, %s1342_s20  ;;  %p1350_p2 = scmp.lt.s32.totalorder %s1348_s24, %s1342_s20 }
  0x21   : > { %1196 = vmatprep.subr.bf16.mxu1 %v1421_v5  ;;  %v1132_v3 = vld [vmem:[%s1729_s4] ss:$0 sm:$0xff] }
  0x22   : > { %1118 = vmatmul.mubr.msk.bf16.vlgmr.msra.gmra.mxu0 %vm454_vm1, %v429_v9  ;;  %v1133_v6 = vld [vmem:[%s1730_s5] ss:$0 sm:$0xff]  ;;  %p1344_p13 = pnand %p1343_p12, %p1529_p4  ;;  %p1351_p3 = por %p1350_p2, %p1349_p1 }
  0x23   : > { %1187 = vmatmul.mubr.msk.bf16.vlgmr.msra.gmra.mxu1 %vm454_vm1, %v429_v9  ;;  %1192 = vmatprep.mubr.msk.bf16.mxu0 %vm1422_vm0, %v1421_v5  ;;  %v1326_v9 = vld [vmem:[%s1733_s8 + $0x38] sm:$0xff]  }
  0x24   : > { %1198 = vmatprep.mubr.msk.bf16.mxu1 %vm1422_vm0, %v1421_v5  ;;  %p1345_p0 = pneg %p1344_p13 }
  0x26   : > { %p1352_p5 = pnand %p1351_p3, %p1345_p0 }
  0xe2   : > { %v492_v10 = vpop.f32.mrf.mxu0 }
  0xe3   : > { %v566_v11 = vpop.f32.mrf.mxu1 }
  0xe4   : > { %v494_v12 = vpop.f32.mrf.mxu0  ;;  %v574_v22 = vpack.c.bf16 %v566_v11, %v566_v11  ;;  %v1327_v11 = vld [vmem:[%s1733_s8 + $0x30] sm:$0xff]  }
  0xe5   : > { %v1153_v13 = vpack.c.bf16 %v494_v12, %v492_v10  ;;  %v1188_v14 = vpop.f32.mrf.mxu1  ;;  %v1328_v12 = vld [vmem:[%s1733_s8 + $0x28] sm:$0xff]  }
  0xe6   : > { %v496_v15 = vpop.f32.mrf.mxu0  ;;  %v1330_v14 = vld [vmem:[%s1733_s8 + $0x18] sm:$0xff]  }
  0xe7   : > { %507 = vst [vmem:[#allocation2] sm:$0xff] %v1153_v13  ;;  %v569_v16 = vpop.f32.mrf.mxu1  ;;  %v1329_v13 = vld [vmem:[%s1733_s8 + $0x20] sm:$0xff]   ;;  %v1331_v15 = vld [vmem:[%s1733_s8 + $0x10] sm:$0xff]  }
  0xe8   : > { %v497_v17 = vpop.f32.mrf.mxu0  ;;  %v1332_v16 = vld [vmem:[%s1733_s8 + $0x8] sm:$0xff]  }
  0xe9   : > { %v1189_v18 = vpop.f32.mrf.mxu1  ;;  %v1333_v17 = vld [vmem:[%s1733_s8] sm:$0xff]  }
  0xea   : > { %v1134_v18 = vld [vmem:[%s1732_s7] ss:$0 sm:$0xff] }
  0xee   : > { %v572_v19 = vld [vmem:[#allocation2] sm:$0xf]  ;;  %v573_v20 = vld [vmem:[#allocation2 + $0x4] sm:$0xf] }
  0xef   : > { %1191 = vmatpush3.bf16.xpose.msra.mxu0 %v572_v19  ;;  %v631_v21 = vsel %vm629_vm2, %v573_v20, 0 }
  0xf0   : > { %1197 = vmatpush3.bf16.msra.mxu1 %v631_v21  ;;  %1202 = vmatprep.subr.bf16.mxu0 %v1421_v5 }
  0xf1   : > { %1222 = vmatprep.subr.bf16.mxu1 %v1421_v5 }
  0xf6   : > { %1193 = vmatmul.mubr.bf16.vlgmr.msra.gmra.mxu0 %v574_v22 }
  0xf7   : > { %1218 = vmatprep.mubr.msk.bf16.mxu0 %vm1422_vm0, %v1421_v5  ;;  %1203 = vmatpush3.bf16.msra.mxu0 %v1316_v34 }
  0xf8   : > { %1204 = vmatprep.subr.bf16.mxu0 %v1421_v5 }
  0xfb   : > { %1205 = vmatpush3.bf16.msra.mxu0 %v1317_v35 }
  0xfc   : > { %1206 = vmatprep.subr.bf16.mxu0 %v1421_v5 }
  0xff   : > { %1207 = vmatpush3.bf16.msra.mxu0 %v1318_v36 }
 0x100   : > { %1208 = vmatprep.subr.bf16.mxu0 %v1421_v5 }
 0x103   : > { %1209 = vmatpush3.bf16.msra.mxu0 %v1319_v37 }
 0x104   : > { %1210 = vmatprep.subr.bf16.mxu0 %v1421_v5 }
 0x107   : > { %1211 = vmatpush3.bf16.msra.mxu0 %v1320_v38 }
 0x108   : > { %1212 = vmatprep.subr.bf16.mxu0 %v1421_v5 }
 0x10b   : > { %1213 = vmatpush3.bf16.msra.mxu0 %v1321_v39 }
 0x10c   : > { %1214 = vmatprep.subr.bf16.mxu0 %v1421_v5 }
 0x10f   : > { %1215 = vmatpush3.bf16.msra.mxu0 %v1322_v40 }
 0x110   : > { %1216 = vmatprep.subr.bf16.mxu0 %v1421_v5 }
 0x113   : > { %1217 = vmatpush3.bf16.msra.mxu0 %v1323_v41 }
 0x1b6   : > { %v609_v23 = vpop.f32.mrf.mxu0 }
 0x1b7   : > { %v616_v24 = vsel %vm615_vm3, %v609_v23, -inf }
 0x1b8   : > { %617 = vmax.xlane.f32.xlu0 %v616_v24  ;;  %v1194_v25 = vpop.f32.mrf.mxu0 }
 0x1ba   : > { %v612_v26 = vpop.f32.mrf.mxu0 }
 0x1bc   : > { %v1195_v27 = vpop.f32.mrf.mxu0 }
 0x241   : > { %v618_v28 = vpop.xlane.xlu0 %617 }
 0x242   : > { %v619_v29 = vsub.f32 %v609_v23, %v618_v28 }
 0x244   : > { %v620_v30 = vmul.f32 1.442695, %v619_v29 }
 0x246   : > { %1334 = vpow2.f32 %v620_v30 }
 0x253   : > { %v1335_v31 = vpop.eup %1334 }
 0x254   : > { %v622_v32 = vsel %vm615_vm3, %v1335_v31, 0.0  ;;  %v625_v33 = vpack.c.bf16 %v1335_v31, %v1335_v31 }
 0x255   : > { %623 = vadd.xlane.f32.xlu0 %v622_v32 }
 0x256   : > { %1199 = vmatmul.mubr.msk.bf16.vlgmr.msra.gmra.mxu1 %vm615_vm3, %v625_v33 }
 0x257   : > { %1226 = vmatprep.mubr.msk.bf16.mxu1 %vm1422_vm0, %v1421_v5  ;;  %1223 = vmatpush3.bf16.msra.mxu1 %v1324_v61 }
 0x258   : > { %1224 = vmatprep.subr.bf16.mxu1 %v1421_v5 }
 0x25b   : > { %1225 = vmatpush3.bf16.msra.mxu1 %v1325_v62 }
 0x25c   : > { %1230 = vmatprep.subr.bf16.mxu1 %v1421_v5 }
 0x2de   : > { %v624_v42 = vpop.xlane.xlu0 %623 }
 0x2df   : > { %1336 = vrcp.f32 %v624_v42  ;;  %v1147_v42 = vld [vmem:[%s1735_s10] ss:$0 sm:$0xff] }
 0x2ec   : > { %v1337_v43 = vpop.eup %1336 }
 0x316   : > { %v667_v44 = vpop.f32.mrf.mxu1 }
 0x317   : > { %v674_v45 = vmul.f32 %v1337_v43, %v667_v44  ;;  %v1148_v44 = vld [vmem:[%s1736_s11] ss:$0 sm:$0xff] }
 0x318   : > { %v1200_v46 = vpop.f32.mrf.mxu1 }
 0x319   : > { %v675_v47 = vpack.c.bf16 %v674_v45, %v674_v45 }
 0x31a   : > { %v670_v48 = vpop.f32.mrf.mxu1 }
 0x31b   : > { %1219 = vmatmul.mubr.bf16.vlgmr.msra.gmra.mxu0 %v675_v47 }
 0x31c   : > { %v1201_v49 = vpop.f32.mrf.mxu1 }
 0x3db   : > { %v774_v50 = vpop.f32.mrf.mxu0 }
 0x3dc   : > { %v780_v51 = vadd.f32 %v774_v50, %v1571_v8 }
 0x3dd   : > { %v1220_v52 = vpop.f32.mrf.mxu0 }
 0x3de   : > { %v783_v53 = vsel %vm454_vm1, %v780_v51, 0.0 }
 0x3df   : > { %784 = vadd.xlane.f32.xlu1 %v783_v53  ;;  %v777_v54 = vpop.f32.mrf.mxu0 }
 0x3e1   : > { %v1221_v55 = vpop.f32.mrf.mxu0 }
 0x468   : > { %v785_v56 = vpop.xlane.xlu1 %784 }
 0x469   : > { %v787_v57 = vmul.f32 0.03125, %v785_v56 }
 0x46b   : > { %v788_v58 = vsub.f32 %v780_v51, %v787_v57 }
 0x46d   : > { %v789_v59 = vmul.f32 %v788_v58, %v788_v58 }
 0x46f   : > { %v790_v60 = vsel %vm454_vm1, %v789_v59, 0.0 }
 0x470   : > { %791 = vadd.xlane.f32.xlu1 %v790_v60 }
 0x4f9   : > { %v792_v63 = vpop.xlane.xlu1 %791 }
 0x4fa   : > { %v793_v0 = vmul.f32 0.03125, %v792_v63 }
 0x4fc   : > { %v794_v1 = vadd.f32 1e-05, %v793_v0 }
 0x4fe   : > { %1338 = vrsqrt.f32 %v794_v1 }
 0x50b   : > { %v1339_v2 = vpop.eup %1338 }
 0x50c   : > { %v796_v4 = vmul.f32 %v1339_v2, %v788_v58 }
 0x50e   : > { %v803_v7 = vmul.f32 %v1132_v3, %v796_v4 }
 0x510   : > { %v810_v8 = vadd.f32 %v1133_v6, %v803_v7 }
 0x512   : > { %v811_v10 = vpack.c.bf16 %v810_v8, %v810_v8 }
 0x514   : > { %1227 = vmatmul.mubr.msk.bf16.vlgmr.msra.gmra.mxu1 %vm454_vm1, %v811_v10 }
 0x515   : > { %1231 = vmatpush3.bf16.msra.mxu1 %v1326_v9  ;;  %1246 = vmatprep.mubr.msk.bf16.mxu1 %vm1422_vm0, %v1421_v5 }
 0x516   : > { %1232 = vmatprep.subr.bf16.mxu1 %v1421_v5 }
 0x519   : > { %1233 = vmatpush3.bf16.msra.mxu1 %v1327_v11 }
 0x51a   : > { %1234 = vmatprep.subr.bf16.mxu1 %v1421_v5 }
 0x51d   : > { %1235 = vmatpush3.bf16.msra.mxu1 %v1328_v12 }
 0x51e   : > { %1236 = vmatprep.subr.bf16.mxu1 %v1421_v5 }
 0x521   : > { %1237 = vmatpush3.bf16.msra.mxu1 %v1329_v13 }
 0x522   : > { %1238 = vmatprep.subr.bf16.mxu1 %v1421_v5 }
 0x525   : > { %1239 = vmatpush3.bf16.msra.mxu1 %v1330_v14 }
 0x526   : > { %1240 = vmatprep.subr.bf16.mxu1 %v1421_v5 }
 0x529   : > { %1241 = vmatpush3.bf16.msra.mxu1 %v1331_v15 }
 0x52a   : > { %1242 = vmatprep.subr.bf16.mxu1 %v1421_v5 }
 0x52d   : > { %1243 = vmatpush3.bf16.msra.mxu1 %v1332_v16 }
 0x52e   : > { %1244 = vmatprep.subr.bf16.mxu1 %v1421_v5  ;;  %v1138_v5 = vld [vmem:[%s1734_s9] ss:$0 sm:$0xff] }
 0x531   : > { %1245 = vmatpush3.bf16.msra.mxu1 %v1333_v17 }
 0x5d4   : > { %v872_v19 = vpop.f32.mrf.mxu1 }
 0x5d5   : > { %v873_v20 = vadd.f32 %v1134_v18, %v872_v19 }
 0x5d6   : > { %v1228_v21 = vpop.f32.mrf.mxu1 }
 0x5d7   : > { %v878_v22 = vmax.f32 %v873_v20, 0.0 }
 0x5d8   : > { %v875_v23 = vpop.f32.mrf.mxu1 }
 0x5d9   : > { %v879_v24 = vpack.c.bf16 %v878_v22, %v878_v22 }
 0x5da   : > { %v1229_v25 = vpop.f32.mrf.mxu1 }
 0x5db   : > { %1247 = vmatmul.mubr.bf16.vlgmr.msra.gmra.mxu1 %v879_v24 }
 0x69b   : > { %v985_v26 = vpop.f32.mrf.mxu1 }
 0x69c   : > { %v986_v27 = vadd.f32 %v1138_v5, %v985_v26 }
 0x69d   : > { %v1248_v28 = vpop.f32.mrf.mxu1 }
 0x69e   : > { %v991_v29 = vadd.f32 %v986_v27, %v810_v8 }
 0x69f   : > { %v988_v30 = vpop.f32.mrf.mxu1 }
 0x6a0   : > { %v994_v31 = vsel %vm454_vm1, %v991_v29, 0.0 }
 0x6a1   : > { %995 = vadd.xlane.f32.xlu0 %v994_v31  ;;  %v1249_v32 = vpop.f32.mrf.mxu1 }
 0x72a   : > { %v996_v33 = vpop.xlane.xlu0 %995 }
 0x72b   : > { %v997_v34 = vmul.f32 0.03125, %v996_v33 }
 0x72d   : > { %v998_v35 = vsub.f32 %v991_v29, %v997_v34 }
 0x72f   : > { %v999_v36 = vmul.f32 %v998_v35, %v998_v35 }
 0x731   : > { %v1000_v37 = vsel %vm454_vm1, %v999_v36, 0.0 }
 0x732   : > { %1001 = vadd.xlane.f32.xlu1 %v1000_v37 }
 0x7bb   : > { %v1002_v38 = vpop.xlane.xlu1 %1001 }
 0x7bc   : > { %v1003_v39 = vmul.f32 0.03125, %v1002_v38 }
 0x7be   : > { %v1004_v40 = vadd.f32 1e-05, %v1003_v39 }
 0x7c0   : > { %1340 = vrsqrt.f32 %v1004_v40 }
 0x7cd   : > { %v1341_v41 = vpop.eup %1340 }
 0x7ce   : > { %v1006_v43 = vmul.f32 %v1341_v41, %v998_v35 }
 0x7d0   : > { %v1013_v45 = vmul.f32 %v1147_v42, %v1006_v43 }
 0x7d2   : > { %v1020_v46 = vadd.f32 %v1148_v44, %v1013_v45 }
 0x7d4   : > { %1021 = vst.msk [vmem:[%s418_s29] sm:$0xff] %vm454_vm1, %v1020_v46 }
 0x7d5   : > { %1355 = shalt.err (!%p1352_p5)
}
 0x7d6   : > { %s1356_s0 = scalar_lea.hbm %s1035_s1, 128  ;;  %s1360_s30 = scalar_lea.hbm %s1737_s12, 256 }
 0x7d7   : > { %p1357_p6 = scmp.ne.s32.totalorder %s1035_s1, %s1356_s0  ;;  %p1361_p10 = scmp.lt.s32.totalorder %s1035_s1, %s1737_s12 }
 0x7d8   : > { %p1362_p11 = scmp.lt.s32.totalorder %s1360_s30, %s1356_s0 }
 0x7d9   : > { %p1358_p7 = pnand %p1357_p6, %p1529_p4 }
 0x7da   : > { %p1363_p12 = por %p1362_p11, %p1361_p10 }
 0x7db   : > { %p1359_p9 = pneg %p1358_p7 }
 0x7dd   : > { %p1364_p13 = pnand %p1363_p12, %p1359_p9 }
 0x7df   : > { %1367 = shalt.err (!%p1364_p13)
}
 0x7e0   : > { %1250 = dma.vmem_to_hbm [thread:$0]  (%p1529_p4), %s1038_s14, 128, %s1035_s1, %s1023_s2  }
 0x7e1 PF: > { %p1256_p0 = scmp.ge.s32.totalorder %s1418_s26, 2  ;;  %s1049_s17 = sand.u32 1, %s1398_s21  }
 0x7e2   : > { %s1050_s20 = scalar_lea.sflag [#allocation4], %s1049_s17 }
 0x7e3   : > { %p1253_p1 = pnand %p1256_p0, %p1536_p8 }
 0x7e5   : > { %p1254_p2 = pneg %p1253_p1 }
 0x7e7   : > { %1393 = dma.done.wait (%p1254_p2), %s1050_s20, 128  }
 0x7e8   : > { %1395 = vsyncadd (%p1254_p2), %s1050_s20, 4294967168  ;;  %s25_s26 = sadd.s32 1, %s1418_s26   ;;  %s1750_s24 = sld [smem:[#allocation6_spill]] }
 0x7e9   : > { %p22_p3 = scmp.ge.s32.totalorder %s25_s26, 4   ;;  %s1751_s25 = sld [smem:[#allocation7_spill]] }
 0x7ea   : > { %s1752_s21 = smov %s1402_s22  ;;  %s1753_s22 = smov %s1406_s23 }
 0x7eb   : > { %s1754_s23 = smov %s1542_s16  ;;  %24 = sbr.rel (!%p22_p3) target bundleno = 8 (0x8), region = 108 }
 0x7f0   :  { %1055 = vsyncpa [#allocation4], 1 }
 0x7f1   :  { %1057 = vsyncpa [#allocation4 + $0x1], 1 }

</bundles_post_ra>
